<compile_context>
chip_gen: v7x
topology: tpu7x:2x2x1
jax: 0.10.0
libtpu: 0.0.40
codegen_flags: <defaults>
</compile_context>

<pallas_src>
import functools
import math

import jax
import jax.numpy as jnp
from jax.experimental import pallas as pl
from jax.experimental.pallas import tpu as pltpu


_MXU_DTYPE = jnp.bfloat16   # MXU operand dtype; accumulation / softmax / LN stay f32


# ----------------------------------------------------------------------------
# helpers
# ----------------------------------------------------------------------------
def _pick_tile(n, target, align):
    """Largest tile <= target that divides n and is a multiple of `align`."""
    if n <= target:
        return n
    t = target - (target % align)
    while t >= align:
        if n % t == 0:
            return t
        t -= align
    return n


# ----------------------------------------------------------------------------
# Pallas kernels
# ----------------------------------------------------------------------------
def _self_attn_kernel(x_ref, bias_ref, wqkv_ref, bqkv_ref, wo_ref, bo_ref,
                      wq2_ref, bq2_ref, o_ref, ctx_ref, *, n_heads):
    """One batch: fused QKV projection + self-attention (probs discarded) +
    output projection + residual(query) + cross-attention Q projection.
    q1 / qkv never leave VMEM; output is the bf16 pre-scaled cross-attn query."""
    D = x_ref.shape[-1]
    dk = D // n_heads
    x = x_ref[0].astype(jnp.float32)                                   # (Lq, D) residual
    qkv = (jnp.dot(x.astype(_MXU_DTYPE), wqkv_ref[...],                # bf16 x bf16 -> f32
                   preferred_element_type=jnp.float32) + bqkv_ref[...])  # (Lq, 3D)
    bias = bias_ref[0]                                                  # (1, Lk) additive mask
    for h in range(n_heads):
        lo = h * dk
        qh = qkv[:, lo:lo + dk].astype(_MXU_DTYPE)       # 1/sqrt(dk) pre-folded into Wq
        kh = qkv[:, D + lo:D + lo + dk].astype(_MXU_DTYPE)
        vh = qkv[:, 2 * D + lo:2 * D + lo + dk].astype(_MXU_DTYPE)
        s = jax.lax.dot_general(qh, kh, (((1,), (1,)), ((), ())),
                                preferred_element_type=jnp.float32) + bias
        e = jnp.exp(s - jnp.max(s, axis=-1, keepdims=True))
        p = e / jnp.sum(e, axis=-1, keepdims=True)
        # eager per-head store keeps the live vreg set to one head
        ctx_ref[:, lo:lo + dk] = jnp.dot(p.astype(_MXU_DTYPE), vh,
                                         preferred_element_type=jnp.float32
                                         ).astype(ctx_ref.dtype)
    q1 = (x + jnp.dot(ctx_ref[...], wo_ref[...],
                      preferred_element_type=jnp.float32) + bo_ref[...])
    q_proj = (jnp.dot(q1.astype(_MXU_DTYPE), wq2_ref[...],
                      preferred_element_type=jnp.float32) + bq2_ref[...])
    o_ref[0] = q_proj.astype(o_ref.dtype)                               # lane-dense bf16 store


def _cross_attn_kernel(qp_ref, key_ref, bias_ref, wkv_ref, bkv_ref, wo_ref, bo_ref,
                       r_ref, o_ref, *rest, n_heads):
    """One batch: fused KV projection + cross-attention (+ optional prob writeback)
    + output projection + residual = ORIGINAL query."""
    if len(rest) == 2:
        a_ref, ctx_ref = rest          # probs requested
    else:
        a_ref = None
        (ctx_ref,) = rest
    D = r_ref.shape[-1]
    dk = D // n_heads
    qp = qp_ref[0]                                                     # (Lq, D) bf16, pre-scaled
    kv = (jnp.dot(key_ref[0].astype(_MXU_DTYPE), wkv_ref[...],
                  preferred_element_type=jnp.float32) + bkv_ref[...])  # (Lk, 2D)
    bias = bias_ref[0]                                                  # (1, Lk)
    for h in range(n_heads):
        lo = h * dk
        kh = kv[:, lo:lo + dk].astype(_MXU_DTYPE)
        vh = kv[:, D + lo:D + lo + dk].astype(_MXU_DTYPE)
        s = jax.lax.dot_general(qp[:, lo:lo + dk], kh, (((1,), (1,)), ((), ())),
                                preferred_element_type=jnp.float32) + bias
        e = jnp.exp(s - jnp.max(s, axis=-1, keepdims=True))
        p = e / jnp.sum(e, axis=-1, keepdims=True)
        if a_ref is not None:
            a_ref[0, h] = p                                             # eager per-head store
        ctx_ref[:, lo:lo + dk] = jnp.dot(p.astype(_MXU_DTYPE), vh,
                                         preferred_element_type=jnp.float32
                                         ).astype(ctx_ref.dtype)
    q2 = (r_ref[0].astype(jnp.float32)
          + jnp.dot(ctx_ref[...], wo_ref[...], preferred_element_type=jnp.float32)
          + bo_ref[...])
    o_ref[0] = q2.astype(o_ref.dtype)


def _ln_ffn_kernel(x_ref, a_ref, b_ref, w1_ref, b1_ref, w2_ref, b2_ref, o_ref,
                   normed_ref, acc_ref, *, eps):
    """Fused LayerNorm + FFN(relu) + residual with Dff tiled via an f32 accumulator."""
    j = pl.program_id(1)

    @pl.when(j == 0)
    def _():
        x = x_ref[...].astype(jnp.float32)
        d = x.shape[-1]
        mean = jnp.mean(x, axis=-1, keepdims=True)
        diff = x - mean
        # torch.Tensor.std is unbiased (n-1), matching the Annotated-Transformer LayerNorm
        var = jnp.sum(diff * diff, axis=-1, keepdims=True) / jnp.float32(d - 1)
        normed = a_ref[...] * diff / (jnp.sqrt(var) + eps) + b_ref[...]
        normed_ref[...] = normed.astype(normed_ref.dtype)
        acc_ref[...] = jnp.zeros_like(acc_ref)

    h = jnp.dot(normed_ref[...], w1_ref[...],
                preferred_element_type=jnp.float32) + b1_ref[...]
    h = jnp.maximum(h, 0.0)
    acc_ref[...] += jnp.dot(h.astype(_MXU_DTYPE), w2_ref[...],
                            preferred_element_type=jnp.float32)

    @pl.when(j == pl.num_programs(1) - 1)
    def _():
        o_ref[...] = (x_ref[...].astype(jnp.float32) + acc_ref[...]
                      + b2_ref[...]).astype(o_ref.dtype)


# ----------------------------------------------------------------------------
# Wrappers (pallas_call plumbing)
# ----------------------------------------------------------------------------
def self_attn_block(query, src_bias, w_qkv, b_qkv, wo, bo, wq2, bq2, n_heads):
    """Self-attn sublayer (+ residual query) with the cross-attn Q projection fused;
    weights are bf16 and VMEM-resident across the (B,) grid."""
    B, Lq, D = query.shape
    kern = functools.partial(_self_attn_kernel, n_heads=n_heads)
    return pl.pallas_call(
        kern,
        out_shape=jax.ShapeDtypeStruct((B, Lq, D), _MXU_DTYPE),
        grid=(B,),
        in_specs=[pl.BlockSpec((1, Lq, D), lambda b: (b, 0, 0)),
                  pl.BlockSpec((1, 1, Lq), lambda b: (b, 0, 0)),
                  pl.BlockSpec((D, 3 * D), lambda b: (0, 0)),
                  pl.BlockSpec((1, 3 * D), lambda b: (0, 0)),
                  pl.BlockSpec((D, D), lambda b: (0, 0)),
                  pl.BlockSpec((1, D), lambda b: (0, 0)),
                  pl.BlockSpec((D, D), lambda b: (0, 0)),
                  pl.BlockSpec((1, D), lambda b: (0, 0))],
        out_specs=pl.BlockSpec((1, Lq, D), lambda b: (b, 0, 0)),
        scratch_shapes=[pltpu.VMEM((Lq, D), _MXU_DTYPE)],
        compiler_params=pltpu.CompilerParams(dimension_semantics=("parallel",)),
    )(query, src_bias, w_qkv, b_qkv.reshape(1, 3 * D), wo, bo.reshape(1, D),
      wq2, bq2.reshape(1, D))


def cross_attn_block(q_proj, key_feat, tgt_bias, w_kv, b_kv, wo, bo, residual,
                     n_heads, return_attn=True):
    """Cross-attn sublayer (residual = ORIGINAL query); optionally returns attn probs."""
    B, Lq, D = q_proj.shape
    Lk = key_feat.shape[1]
    kern = functools.partial(_cross_attn_kernel, n_heads=n_heads)
    if return_attn:
        out_shape = (jax.ShapeDtypeStruct((B, Lq, D), residual.dtype),
                     jax.ShapeDtypeStruct((B, n_heads, Lq, Lk), jnp.float32))
        out_specs = (pl.BlockSpec((1, Lq, D), lambda b: (b, 0, 0)),
                     pl.BlockSpec((1, n_heads, Lq, Lk), lambda b: (b, 0, 0, 0)))
    else:
        out_shape = jax.ShapeDtypeStruct((B, Lq, D), residual.dtype)
        out_specs = pl.BlockSpec((1, Lq, D), lambda b: (b, 0, 0))
    res = pl.pallas_call(
        kern,
        out_shape=out_shape,
        grid=(B,),
        in_specs=[pl.BlockSpec((1, Lq, D), lambda b: (b, 0, 0)),
                  pl.BlockSpec((1, Lk, D), lambda b: (b, 0, 0)),
                  pl.BlockSpec((1, 1, Lk), lambda b: (b, 0, 0)),
                  pl.BlockSpec((D, 2 * D), lambda b: (0, 0)),
                  pl.BlockSpec((1, 2 * D), lambda b: (0, 0)),
                  pl.BlockSpec((D, D), lambda b: (0, 0)),
                  pl.BlockSpec((1, D), lambda b: (0, 0)),
                  pl.BlockSpec((1, Lq, D), lambda b: (b, 0, 0))],
        out_specs=out_specs,
        scratch_shapes=[pltpu.VMEM((Lq, D), _MXU_DTYPE)],
        compiler_params=pltpu.CompilerParams(dimension_semantics=("parallel",)),
    )(q_proj, key_feat, tgt_bias, w_kv, b_kv.reshape(1, 2 * D), wo,
      bo.reshape(1, D), residual)
    if return_attn:
        return res
    return res, None


def ln_ffn_residual(x, ln_a, ln_b, w1, b1, w2, b2, eps=1e-6):
    """out = x + W2 @ relu(W1 @ layernorm(x) + b1) + b2, fused, M- and Dff-tiled.
    Conservative tiles (tm<=256, tff<=512) keep the kernel inside v5e's 16 MiB
    default scoped VMEM and v7x's 64 MiB physical VMEM with bf16 weights."""
    M, D = x.shape
    Dff = w1.shape[1]
    tm = _pick_tile(M, 256, 8)
    tff = _pick_tile(Dff, 512, 128)
    kern = functools.partial(_ln_ffn_kernel, eps=eps)
    return pl.pallas_call(
        kern,
        out_shape=jax.ShapeDtypeStruct((M, D), x.dtype),
        grid=(M // tm, Dff // tff),
        in_specs=[pl.BlockSpec((tm, D), lambda i, j: (i, 0)),
                  pl.BlockSpec((1, D), lambda i, j: (0, 0)),
                  pl.BlockSpec((1, D), lambda i, j: (0, 0)),
                  pl.BlockSpec((D, tff), lambda i, j: (0, j)),
                  pl.BlockSpec((1, tff), lambda i, j: (0, j)),
                  pl.BlockSpec((tff, D), lambda i, j: (j, 0)),
                  pl.BlockSpec((1, D), lambda i, j: (0, 0))],
        out_specs=pl.BlockSpec((tm, D), lambda i, j: (i, 0)),
        scratch_shapes=[pltpu.VMEM((tm, D), _MXU_DTYPE),
                        pltpu.VMEM((tm, D), jnp.float32)],
        compiler_params=pltpu.CompilerParams(
            dimension_semantics=("parallel", "arbitrary")),
    )(x, ln_a.reshape(1, D), ln_b.reshape(1, D),
      w1, b1.reshape(1, Dff), w2, b2.reshape(1, D))


def decoder_layer(query, key_feat, src_mask, tgt_mask, params, n_heads,
                  return_attn=True):
    B, Lq, D = query.shape
    scale = 1.0 / math.sqrt(D // n_heads)
    sa, ca = params["self_attn"], params["cross_attn"]

    # host-side prep (cheap, one-shot): fold 1/sqrt(dk) into the Q projections,
    # cast all weight matrices to bf16, turn {0,1} masks into additive biases.
    q_scale = jnp.concatenate([jnp.full((D,), scale, jnp.float32),
                               jnp.ones((2 * D,), jnp.float32)])
    w_qkv = (sa["w_qkv"] * q_scale[None, :]).astype(_MXU_DTYPE)
    b_qkv = sa["b_qkv"] * q_scale
    wo_s = sa["wo"].astype(_MXU_DTYPE)
    wq_c = (ca["wq"] * scale).astype(_MXU_DTYPE)
    bq_c = ca["bq"] * scale
    w_kv = ca["w_kv"].astype(_MXU_DTYPE)
    wo_c = ca["wo"].astype(_MXU_DTYPE)
    w1 = params["w1"].astype(_MXU_DTYPE)
    w2 = params["w2"].astype(_MXU_DTYPE)
    src_bias = (src_mask.astype(jnp.float32) - 1.0) * jnp.float32(1e9)
    tgt_bias = (tgt_mask.astype(jnp.float32) - 1.0) * jnp.float32(1e9)

    # sublayer[0]: self-attn (+ residual query) with cross-attn Q projection fused in
    q_proj = self_attn_block(query, src_bias, w_qkv, b_qkv, wo_s, sa["bo"],
                             wq_c, bq_c, n_heads)

    # sublayer[1]: cross-attn with fused KV projection; residual = ORIGINAL query
    q2, cross_attn_w = cross_attn_block(q_proj, key_feat, tgt_bias, w_kv, ca["b_kv"],
                                        wo_c, ca["bo"], query, n_heads, return_attn)

    # sublayer[2]: out = q2 + FF(LayerNorm(q2))  (fully fused)
    out = ln_ffn_residual(q2.reshape(B * Lq, D), params["ln_a"], params["ln_b"],
                          w1, params["b1"], w2, params["b2"])
    return out.reshape(B, Lq, D), cross_attn_w


# ----------------------------------------------------------------------------
# Deterministic parameter init (f32, faithful to the PyTorch parameterization)
# ----------------------------------------------------------------------------
def init_params(key, d_model, d_ff):
    ks = jax.random.split(key, 10)
    w = lambda k, shp: (0.05 * jax.random.normal(k, shp)).astype(jnp.float32)
    z = lambda n: jnp.zeros((n,), jnp.float32)
    return {
        "self_attn": {
            # [Wq | Wk | Wv] concatenated for one wide MXU pass
            "w_qkv": jnp.concatenate([w(ks[0], (d_model, d_model)),
                                      w(ks[1], (d_model, d_model)),
                                      w(ks[2], (d_model, d_model))], axis=1),
            "b_qkv": z(3 * d_model),
            "wo": w(ks[3], (d_model, d_model)), "bo": z(d_model),
        },
        "cross_attn": {
            "wq": w(ks[4], (d_model, d_model)), "bq": z(d_model),
            # [Wk | Wv] concatenated (K = V = key features)
            "w_kv": jnp.concatenate([w(ks[5], (d_model, d_model)),
                                     w(ks[6], (d_model, d_model))], axis=1),
            "b_kv": z(2 * d_model),
            "wo": w(ks[7], (d_model, d_model)), "bo": z(d_model),
        },
        "ln_a": jnp.ones((d_model,), jnp.float32),
        "ln_b": jnp.zeros((d_model,), jnp.float32),
        "w1": w(ks[8], (d_model, d_ff)), "b1": z(d_ff),
        "w2": w(ks[9], (d_ff, d_model)), "b2": z(d_model),
    }


if __name__ == "__main__":
    B, Lq, Lk, D, H, DFF = 2, 8, 8, 32, 4, 64
    root = jax.random.PRNGKey(0)
    k_q, k_k, k_p = jax.random.split(root, 3)

    query = jax.random.normal(k_q, (B, Lq, D), dtype=jnp.float32)
    key_feat = jax.random.normal(k_k, (B, Lk, D), dtype=jnp.float32)

    src_mask = jnp.ones((B, 1, Lq), jnp.float32).at[1, 0, 6:].set(0.0)  # self-attn key mask
    tgt_mask = jnp.ones((B, 1, Lk), jnp.float32).at[0, 0, 7:].set(0.0)  # cross-attn key mask

    params = init_params(k_p, D, DFF)

    out, attn = decoder_layer(query, key_feat, src_mask, tgt_mask, params, n_heads=H)
    jax.block_until_ready(out)
    jax.block_until_ready(attn)

    assert out.shape == (B, Lq, D) and attn.shape == (B, H, Lq, Lk)
    assert bool(jnp.all(jnp.isfinite(out)))
    assert bool(jnp.all(jnp.isfinite(attn)))
    # attention probabilities should sum to ~1 over keys
    assert bool(jnp.all(jnp.abs(jnp.sum(attn, axis=-1) - 1.0) < 1e-3))
    print("KERNEL_OK")
</pallas_src>

<mosaic_0001>
module attributes {stable_mosaic.version = 11 : i64} {
  func.func @_self_attn_kernel(%arg0: i32, %arg1: memref<1x8x32xf32, #tpu.memory_space<vmem>>, %arg2: memref<1x1x8xf32, #tpu.memory_space<vmem>>, %arg3: memref<32x96xbf16, #tpu.memory_space<vmem>>, %arg4: memref<1x96xf32, #tpu.memory_space<vmem>>, %arg5: memref<32x32xbf16, #tpu.memory_space<vmem>>, %arg6: memref<1x32xf32, #tpu.memory_space<vmem>>, %arg7: memref<32x32xbf16, #tpu.memory_space<vmem>>, %arg8: memref<1x32xf32, #tpu.memory_space<vmem>>, %arg9: memref<1x8x32xbf16, #tpu.memory_space<vmem>>, %arg10: memref<8x32xbf16, #tpu.memory_space<vmem>>) attributes {dimension_semantics = [#tpu.dimension_semantics<parallel>], iteration_bounds = array<i64: 2>, scalar_prefetch = 0 : i64, scratch_operands = 1 : i64, tpu.core_type = #tpu.core_type<tc>, window_params = [{transform_indices = @transform_0, window_bounds = array<i64: 1, 8, 32>}, {transform_indices = @transform_1, window_bounds = array<i64: 1, 1, 8>}, {pipeline_mode = #tpu.pipeline_mode<synchronous>, transform_indices = @transform_2, window_bounds = array<i64: 32, 96>}, {pipeline_mode = #tpu.pipeline_mode<synchronous>, transform_indices = @transform_3, window_bounds = array<i64: 1, 96>}, {pipeline_mode = #tpu.pipeline_mode<synchronous>, transform_indices = @transform_4, window_bounds = array<i64: 32, 32>}, {pipeline_mode = #tpu.pipeline_mode<synchronous>, transform_indices = @transform_5, window_bounds = array<i64: 1, 32>}, {pipeline_mode = #tpu.pipeline_mode<synchronous>, transform_indices = @transform_6, window_bounds = array<i64: 32, 32>}, {pipeline_mode = #tpu.pipeline_mode<synchronous>, transform_indices = @transform_7, window_bounds = array<i64: 1, 32>}, {transform_indices = @transform_8, window_bounds = array<i64: 1, 8, 32>}]} {
    %c0 = arith.constant 0 : index
    %c0_0 = arith.constant 0 : index
    %c0_1 = arith.constant 0 : index
    %0 = vector.load %arg1[%c0, %c0_0, %c0_1] : memref<1x8x32xf32, #tpu.memory_space<vmem>>, vector<1x8x32xf32>
    %1 = vector.shape_cast %0 : vector<1x8x32xf32> to vector<8x32xf32>
    %2 = arith.truncf %1 : vector<8x32xf32> to vector<8x32xbf16>
    %c0_2 = arith.constant 0 : index
    %c0_3 = arith.constant 0 : index
    %3 = vector.load %arg3[%c0_2, %c0_3] : memref<32x96xbf16, #tpu.memory_space<vmem>>, vector<32x96xbf16>
    %cst = arith.constant dense<0.000000e+00> : vector<8x96xf32>
    %4 = tpu.matmul %2, %3, %cst {dimension_numbers = #tpu.dot_dimension_numbers<[1], [0], [0], [1], [0, 0, 1, 1], [], []>} : vector<8x32xbf16>, vector<32x96xbf16>, vector<8x96xf32> -> vector<8x96xf32>
    %c0_4 = arith.constant 0 : index
    %c0_5 = arith.constant 0 : index
    %5 = vector.load %arg4[%c0_4, %c0_5] : memref<1x96xf32, #tpu.memory_space<vmem>>, vector<1x96xf32>
    %6 = vector.broadcast %5 : vector<1x96xf32> to vector<8x96xf32>
    %7 = arith.addf %4, %6 : vector<8x96xf32>
    %c0_6 = arith.constant 0 : index
    %c0_7 = arith.constant 0 : index
    %c0_8 = arith.constant 0 : index
    %8 = vector.load %arg2[%c0_6, %c0_7, %c0_8] : memref<1x1x8xf32, #tpu.memory_space<vmem>>, vector<1x1x8xf32>
    %9 = vector.shape_cast %8 : vector<1x1x8xf32> to vector<1x8xf32>
    %10 = vector.extract_strided_slice %7 {offsets = [0, 0], sizes = [8, 8], strides = [1, 1]} : vector<8x96xf32> to vector<8x8xf32>
    %11 = arith.truncf %10 : vector<8x8xf32> to vector<8x8xbf16>
    %12 = vector.extract_strided_slice %7 {offsets = [0, 32], sizes = [8, 8], strides = [1, 1]} : vector<8x96xf32> to vector<8x8xf32>
    %13 = arith.truncf %12 : vector<8x8xf32> to vector<8x8xbf16>
    %14 = vector.extract_strided_slice %7 {offsets = [0, 64], sizes = [8, 8], strides = [1, 1]} : vector<8x96xf32> to vector<8x8xf32>
    %15 = arith.truncf %14 : vector<8x8xf32> to vector<8x8xbf16>
    %cst_9 = arith.constant dense<0.000000e+00> : vector<8x8xf32>
    %16 = tpu.matmul %11, %13, %cst_9 {dimension_numbers = #tpu.dot_dimension_numbers<[1], [1], [0], [0], [0, 0, 1, 0], [], []>} : vector<8x8xbf16>, vector<8x8xbf16>, vector<8x8xf32> -> vector<8x8xf32>
    %17 = vector.broadcast %9 : vector<1x8xf32> to vector<8x8xf32>
    %18 = arith.addf %16, %17 : vector<8x8xf32>
    %cst_10 = arith.constant dense<0xFF800000> : vector<8xf32>
    %19 = vector.multi_reduction <maximumf>, %18, %cst_10 [1] : vector<8x8xf32> to vector<8xf32>
    %20 = vector.shape_cast %19 : vector<8xf32> to vector<8x1xf32>
    %21 = vector.broadcast %20 : vector<8x1xf32> to vector<8x8xf32>
    %22 = arith.subf %18, %21 : vector<8x8xf32>
    %23 = math.exp %22 : vector<8x8xf32>
    %cst_11 = arith.constant dense<0.000000e+00> : vector<8xf32>
    %24 = vector.multi_reduction <add>, %23, %cst_11 [1] : vector<8x8xf32> to vector<8xf32>
    %25 = vector.shape_cast %24 : vector<8xf32> to vector<8x1xf32>
    %26 = vector.broadcast %25 : vector<8x1xf32> to vector<8x8xf32>
    %27 = arith.divf %23, %26 : vector<8x8xf32>
    %28 = arith.truncf %27 : vector<8x8xf32> to vector<8x8xbf16>
    %cst_12 = arith.constant dense<0.000000e+00> : vector<8x8xf32>
    %29 = tpu.matmul %28, %15, %cst_12 {dimension_numbers = #tpu.dot_dimension_numbers<[1], [0], [0], [1], [0, 0, 1, 1], [], []>} : vector<8x8xbf16>, vector<8x8xbf16>, vector<8x8xf32> -> vector<8x8xf32>
    %30 = arith.truncf %29 : vector<8x8xf32> to vector<8x8xbf16>
    %c0_13 = arith.constant 0 : index
    %c0_14 = arith.constant 0 : index
    %31 = vector.load %arg10[%c0_13, %c0_14] : memref<8x32xbf16, #tpu.memory_space<vmem>>, vector<8x8xbf16>
    tpu.vector_store %arg10[%c0_13, %c0_14], %30 {strides = array<i32>} : memref<8x32xbf16, #tpu.memory_space<vmem>>, vector<8x8xbf16>,
    %32 = vector.extract_strided_slice %7 {offsets = [0, 8], sizes = [8, 8], strides = [1, 1]} : vector<8x96xf32> to vector<8x8xf32>
    %33 = arith.truncf %32 : vector<8x8xf32> to vector<8x8xbf16>
    %34 = vector.extract_strided_slice %7 {offsets = [0, 40], sizes = [8, 8], strides = [1, 1]} : vector<8x96xf32> to vector<8x8xf32>
    %35 = arith.truncf %34 : vector<8x8xf32> to vector<8x8xbf16>
    %36 = vector.extract_strided_slice %7 {offsets = [0, 72], sizes = [8, 8], strides = [1, 1]} : vector<8x96xf32> to vector<8x8xf32>
    %37 = arith.truncf %36 : vector<8x8xf32> to vector<8x8xbf16>
    %cst_15 = arith.constant dense<0.000000e+00> : vector<8x8xf32>
    %38 = tpu.matmul %33, %35, %cst_15 {dimension_numbers = #tpu.dot_dimension_numbers<[1], [1], [0], [0], [0, 0, 1, 0], [], []>} : vector<8x8xbf16>, vector<8x8xbf16>, vector<8x8xf32> -> vector<8x8xf32>
    %39 = vector.broadcast %9 : vector<1x8xf32> to vector<8x8xf32>
    %40 = arith.addf %38, %39 : vector<8x8xf32>
    %cst_16 = arith.constant dense<0xFF800000> : vector<8xf32>
    %41 = vector.multi_reduction <maximumf>, %40, %cst_16 [1] : vector<8x8xf32> to vector<8xf32>
    %42 = vector.shape_cast %41 : vector<8xf32> to vector<8x1xf32>
    %43 = vector.broadcast %42 : vector<8x1xf32> to vector<8x8xf32>
    %44 = arith.subf %40, %43 : vector<8x8xf32>
    %45 = math.exp %44 : vector<8x8xf32>
    %cst_17 = arith.constant dense<0.000000e+00> : vector<8xf32>
    %46 = vector.multi_reduction <add>, %45, %cst_17 [1] : vector<8x8xf32> to vector<8xf32>
    %47 = vector.shape_cast %46 : vector<8xf32> to vector<8x1xf32>
    %48 = vector.broadcast %47 : vector<8x1xf32> to vector<8x8xf32>
    %49 = arith.divf %45, %48 : vector<8x8xf32>
    %50 = arith.truncf %49 : vector<8x8xf32> to vector<8x8xbf16>
    %cst_18 = arith.constant dense<0.000000e+00> : vector<8x8xf32>
    %51 = tpu.matmul %50, %37, %cst_18 {dimension_numbers = #tpu.dot_dimension_numbers<[1], [0], [0], [1], [0, 0, 1, 1], [], []>} : vector<8x8xbf16>, vector<8x8xbf16>, vector<8x8xf32> -> vector<8x8xf32>
    %52 = arith.truncf %51 : vector<8x8xf32> to vector<8x8xbf16>
    %c0_19 = arith.constant 0 : index
    %c8 = arith.constant 8 : index
    %53 = vector.load %arg10[%c0_19, %c8] : memref<8x32xbf16, #tpu.memory_space<vmem>>, vector<8x8xbf16>
    tpu.vector_store %arg10[%c0_19, %c8], %52 {strides = array<i32>} : memref<8x32xbf16, #tpu.memory_space<vmem>>, vector<8x8xbf16>,
    %54 = vector.extract_strided_slice %7 {offsets = [0, 16], sizes = [8, 8], strides = [1, 1]} : vector<8x96xf32> to vector<8x8xf32>
    %55 = arith.truncf %54 : vector<8x8xf32> to vector<8x8xbf16>
    %56 = vector.extract_strided_slice %7 {offsets = [0, 48], sizes = [8, 8], strides = [1, 1]} : vector<8x96xf32> to vector<8x8xf32>
    %57 = arith.truncf %56 : vector<8x8xf32> to vector<8x8xbf16>
    %58 = vector.extract_strided_slice %7 {offsets = [0, 80], sizes = [8, 8], strides = [1, 1]} : vector<8x96xf32> to vector<8x8xf32>
    %59 = arith.truncf %58 : vector<8x8xf32> to vector<8x8xbf16>
    %cst_20 = arith.constant dense<0.000000e+00> : vector<8x8xf32>
    %60 = tpu.matmul %55, %57, %cst_20 {dimension_numbers = #tpu.dot_dimension_numbers<[1], [1], [0], [0], [0, 0, 1, 0], [], []>} : vector<8x8xbf16>, vector<8x8xbf16>, vector<8x8xf32> -> vector<8x8xf32>
    %61 = vector.broadcast %9 : vector<1x8xf32> to vector<8x8xf32>
    %62 = arith.addf %60, %61 : vector<8x8xf32>
    %cst_21 = arith.constant dense<0xFF800000> : vector<8xf32>
    %63 = vector.multi_reduction <maximumf>, %62, %cst_21 [1] : vector<8x8xf32> to vector<8xf32>
    %64 = vector.shape_cast %63 : vector<8xf32> to vector<8x1xf32>
    %65 = vector.broadcast %64 : vector<8x1xf32> to vector<8x8xf32>
    %66 = arith.subf %62, %65 : vector<8x8xf32>
    %67 = math.exp %66 : vector<8x8xf32>
    %cst_22 = arith.constant dense<0.000000e+00> : vector<8xf32>
    %68 = vector.multi_reduction <add>, %67, %cst_22 [1] : vector<8x8xf32> to vector<8xf32>
    %69 = vector.shape_cast %68 : vector<8xf32> to vector<8x1xf32>
    %70 = vector.broadcast %69 : vector<8x1xf32> to vector<8x8xf32>
    %71 = arith.divf %67, %70 : vector<8x8xf32>
    %72 = arith.truncf %71 : vector<8x8xf32> to vector<8x8xbf16>
    %cst_23 = arith.constant dense<0.000000e+00> : vector<8x8xf32>
    %73 = tpu.matmul %72, %59, %cst_23 {dimension_numbers = #tpu.dot_dimension_numbers<[1], [0], [0], [1], [0, 0, 1, 1], [], []>} : vector<8x8xbf16>, vector<8x8xbf16>, vector<8x8xf32> -> vector<8x8xf32>
    %74 = arith.truncf %73 : vector<8x8xf32> to vector<8x8xbf16>
    %c0_24 = arith.constant 0 : index
    %c16 = arith.constant 16 : index
    %75 = vector.load %arg10[%c0_24, %c16] : memref<8x32xbf16, #tpu.memory_space<vmem>>, vector<8x8xbf16>
    tpu.vector_store %arg10[%c0_24, %c16], %74 {strides = array<i32>} : memref<8x32xbf16, #tpu.memory_space<vmem>>, vector<8x8xbf16>,
    %76 = vector.extract_strided_slice %7 {offsets = [0, 24], sizes = [8, 8], strides = [1, 1]} : vector<8x96xf32> to vector<8x8xf32>
    %77 = arith.truncf %76 : vector<8x8xf32> to vector<8x8xbf16>
    %78 = vector.extract_strided_slice %7 {offsets = [0, 56], sizes = [8, 8], strides = [1, 1]} : vector<8x96xf32> to vector<8x8xf32>
    %79 = arith.truncf %78 : vector<8x8xf32> to vector<8x8xbf16>
    %80 = vector.extract_strided_slice %7 {offsets = [0, 88], sizes = [8, 8], strides = [1, 1]} : vector<8x96xf32> to vector<8x8xf32>
    %81 = arith.truncf %80 : vector<8x8xf32> to vector<8x8xbf16>
    %cst_25 = arith.constant dense<0.000000e+00> : vector<8x8xf32>
    %82 = tpu.matmul %77, %79, %cst_25 {dimension_numbers = #tpu.dot_dimension_numbers<[1], [1], [0], [0], [0, 0, 1, 0], [], []>} : vector<8x8xbf16>, vector<8x8xbf16>, vector<8x8xf32> -> vector<8x8xf32>
    %83 = vector.broadcast %9 : vector<1x8xf32> to vector<8x8xf32>
    %84 = arith.addf %82, %83 : vector<8x8xf32>
    %cst_26 = arith.constant dense<0xFF800000> : vector<8xf32>
    %85 = vector.multi_reduction <maximumf>, %84, %cst_26 [1] : vector<8x8xf32> to vector<8xf32>
    %86 = vector.shape_cast %85 : vector<8xf32> to vector<8x1xf32>
    %87 = vector.broadcast %86 : vector<8x1xf32> to vector<8x8xf32>
    %88 = arith.subf %84, %87 : vector<8x8xf32>
    %89 = math.exp %88 : vector<8x8xf32>
    %cst_27 = arith.constant dense<0.000000e+00> : vector<8xf32>
    %90 = vector.multi_reduction <add>, %89, %cst_27 [1] : vector<8x8xf32> to vector<8xf32>
    %91 = vector.shape_cast %90 : vector<8xf32> to vector<8x1xf32>
    %92 = vector.broadcast %91 : vector<8x1xf32> to vector<8x8xf32>
    %93 = arith.divf %89, %92 : vector<8x8xf32>
    %94 = arith.truncf %93 : vector<8x8xf32> to vector<8x8xbf16>
    %cst_28 = arith.constant dense<0.000000e+00> : vector<8x8xf32>
    %95 = tpu.matmul %94, %81, %cst_28 {dimension_numbers = #tpu.dot_dimension_numbers<[1], [0], [0], [1], [0, 0, 1, 1], [], []>} : vector<8x8xbf16>, vector<8x8xbf16>, vector<8x8xf32> -> vector<8x8xf32>
    %96 = arith.truncf %95 : vector<8x8xf32> to vector<8x8xbf16>
    %c0_29 = arith.constant 0 : index
    %c24 = arith.constant 24 : index
    %97 = vector.load %arg10[%c0_29, %c24] : memref<8x32xbf16, #tpu.memory_space<vmem>>, vector<8x8xbf16>
    tpu.vector_store %arg10[%c0_29, %c24], %96 {strides = array<i32>} : memref<8x32xbf16, #tpu.memory_space<vmem>>, vector<8x8xbf16>,
    %c0_30 = arith.constant 0 : index
    %c0_31 = arith.constant 0 : index
    %98 = vector.load %arg10[%c0_30, %c0_31] : memref<8x32xbf16, #tpu.memory_space<vmem>>, vector<8x32xbf16>
    %c0_32 = arith.constant 0 : index
    %c0_33 = arith.constant 0 : index
    %99 = vector.load %arg5[%c0_32, %c0_33] : memref<32x32xbf16, #tpu.memory_space<vmem>>, vector<32x32xbf16>
    %cst_34 = arith.constant dense<0.000000e+00> : vector<8x32xf32>
    %100 = tpu.matmul %98, %99, %cst_34 {dimension_numbers = #tpu.dot_dimension_numbers<[1], [0], [0], [1], [0, 0, 1, 1], [], []>} : vector<8x32xbf16>, vector<32x32xbf16>, vector<8x32xf32> -> vector<8x32xf32>
    %101 = arith.addf %1, %100 : vector<8x32xf32>
    %c0_35 = arith.constant 0 : index
    %c0_36 = arith.constant 0 : index
    %102 = vector.load %arg6[%c0_35, %c0_36] : memref<1x32xf32, #tpu.memory_space<vmem>>, vector<1x32xf32>
    %103 = vector.broadcast %102 : vector<1x32xf32> to vector<8x32xf32>
    %104 = arith.addf %101, %103 : vector<8x32xf32>
    %105 = arith.truncf %104 : vector<8x32xf32> to vector<8x32xbf16>
    %c0_37 = arith.constant 0 : index
    %c0_38 = arith.constant 0 : index
    %106 = vector.load %arg7[%c0_37, %c0_38] : memref<32x32xbf16, #tpu.memory_space<vmem>>, vector<32x32xbf16>
    %cst_39 = arith.constant dense<0.000000e+00> : vector<8x32xf32>
    %107 = tpu.matmul %105, %106, %cst_39 {dimension_numbers = #tpu.dot_dimension_numbers<[1], [0], [0], [1], [0, 0, 1, 1], [], []>} : vector<8x32xbf16>, vector<32x32xbf16>, vector<8x32xf32> -> vector<8x32xf32>
    %c0_40 = arith.constant 0 : index
    %c0_41 = arith.constant 0 : index
    %108 = vector.load %arg8[%c0_40, %c0_41] : memref<1x32xf32, #tpu.memory_space<vmem>>, vector<1x32xf32>
    %109 = vector.broadcast %108 : vector<1x32xf32> to vector<8x32xf32>
    %110 = arith.addf %107, %109 : vector<8x32xf32>
    %111 = arith.truncf %110 : vector<8x32xf32> to vector<8x32xbf16>
    %c0_42 = arith.constant 0 : index
    %c0_43 = arith.constant 0 : index
    %c0_44 = arith.constant 0 : index
    %112 = vector.load %arg9[%c0_42, %c0_43, %c0_44] : memref<1x8x32xbf16, #tpu.memory_space<vmem>>, vector<1x8x32xbf16>
    %113 = vector.shape_cast %112 : vector<1x8x32xbf16> to vector<8x32xbf16>
    %114 = vector.shape_cast %111 : vector<8x32xbf16> to vector<1x8x32xbf16>
    tpu.vector_store %arg9[%c0_42, %c0_43, %c0_44], %114 {strides = array<i32>} : memref<1x8x32xbf16, #tpu.memory_space<vmem>>, vector<1x8x32xbf16>,
    return
  }
  func.func @transform_0(%arg0: i32) -> (i32, i32, i32) {
    %c0_i32 = arith.constant 0 : i32
    %c0_i32_0 = arith.constant 0 : i32
    %c0_i32_1 = arith.constant 0 : i32
    return %arg0, %c0_i32, %c0_i32_0 : i32, i32, i32
  }
  func.func @transform_1(%arg0: i32) -> (i32, i32, i32) {
    %c0_i32 = arith.constant 0 : i32
    %c0_i32_0 = arith.constant 0 : i32
    %c0_i32_1 = arith.constant 0 : i32
    return %arg0, %c0_i32, %c0_i32_0 : i32, i32, i32
  }
  func.func @transform_2(%arg0: i32) -> (i32, i32) {
    %c0_i32 = arith.constant 0 : i32
    %c0_i32_0 = arith.constant 0 : i32
    %c0_i32_1 = arith.constant 0 : i32
    return %c0_i32, %c0_i32_0 : i32, i32
  }
  func.func @transform_3(%arg0: i32) -> (i32, i32) {
    %c0_i32 = arith.constant 0 : i32
    %c0_i32_0 = arith.constant 0 : i32
    %c0_i32_1 = arith.constant 0 : i32
    return %c0_i32, %c0_i32_0 : i32, i32
  }
  func.func @transform_4(%arg0: i32) -> (i32, i32) {
    %c0_i32 = arith.constant 0 : i32
    %c0_i32_0 = arith.constant 0 : i32
    %c0_i32_1 = arith.constant 0 : i32
    return %c0_i32, %c0_i32_0 : i32, i32
  }
  func.func @transform_5(%arg0: i32) -> (i32, i32) {
    %c0_i32 = arith.constant 0 : i32
    %c0_i32_0 = arith.constant 0 : i32
    %c0_i32_1 = arith.constant 0 : i32
    return %c0_i32, %c0_i32_0 : i32, i32
  }
  func.func @transform_6(%arg0: i32) -> (i32, i32) {
    %c0_i32 = arith.constant 0 : i32
    %c0_i32_0 = arith.constant 0 : i32
    %c0_i32_1 = arith.constant 0 : i32
    return %c0_i32, %c0_i32_0 : i32, i32
  }
  func.func @transform_7(%arg0: i32) -> (i32, i32) {
    %c0_i32 = arith.constant 0 : i32
    %c0_i32_0 = arith.constant 0 : i32
    %c0_i32_1 = arith.constant 0 : i32
    return %c0_i32, %c0_i32_0 : i32, i32
  }
  func.func @transform_8(%arg0: i32) -> (i32, i32, i32) {
    %c0_i32 = arith.constant 0 : i32
    %c0_i32_0 = arith.constant 0 : i32
    %c0_i32_1 = arith.constant 0 : i32
    return %arg0, %c0_i32, %c0_i32_0 : i32, i32, i32
  }
}

</mosaic_0001>

<bundles_post_ra>
// kernel: tpu_custom_call.1
= control target key start
LH: loop header
LB: loop body
LE: loop exit
PB: predicated region body
PF: predicated region fallthrough
CT: control target
= control target key end

     0   :  { %13 = vsyncpa [#allocation4], 0  ;;  %s1968_s0 = inlined_call_operand.hbm [shape: f32[2,8,32], index: 0, kind: input, shape index: {}]   ;;  %s1969_s1 = inlined_call_operand.vmem [shape: f32[2,1,8], index: 1, kind: input, shape index: {}]   ;;  %s1970_s2 = inlined_call_operand.hbm [shape: bf16[32,96], index: 2, kind: input, shape index: {}]   ;;  %s1971_s3 = inlined_call_operand.vmem [shape: f32[1,96], index: 3, kind: input, shape index: {}]   ;;  %s1972_s4 = inlined_call_operand.hbm [shape: bf16[32,32], index: 4, kind: input, shape index: {}]   ;;  %s1973_s5 = inlined_call_operand.vmem [shape: f32[1,32], index: 5, kind: input, shape index: {}]   ;;  %s1974_s6 = inlined_call_operand.vmem [shape: bf16[32,32], index: 6, kind: input, shape index: {}]   ;;  %s1975_s7 = inlined_call_operand.vmem [shape: f32[1,32], index: 7, kind: input, shape index: {}]   ;;  %s1976_s8 = inlined_call_operand.hbm [shape: bf16[2,8,32], index: 8, kind: output, shape index: {}]  }
   0x1   :  { %15 = vsyncpa [#allocation4 + $0x1], 0 }
   0x2   :  { %16 = vsyncpa [#allocation7], 0 }
   0x3   :  { %17 = vsyncpa [#allocation5], 0 }
   0x4   :  { %19 = vsyncpa [#allocation5 + $0x1], 0  ;;  %s1636_s27 = smov 0   ;;  %s1638_s28 = smov 0  }
   0x5   :  { %s1640_s29 = smov 0   ;;  %s1642_s30 = smov 0  }
   0x6 LB: > { %s1657_s9 = sadd.s32 4294967295, %s1567_s30   ;;  %s1164_s10 = sadd.s32 4294967294, %s1567_s30   ;;  %s1567_s30 = sphi %s1642_s30, %s1996_s30   ;;  %s1563_s29 = sphi %s1640_s29, %s1995_s29   ;;  %s1559_s28 = sphi %s1638_s28, %s1994_s28   ;;  %s1555_s27 = sphi %s1636_s27, %s1993_s27  }
   0x7   : > { %p45_p0 = scmp.ne.s32.totalorder %s1559_s28, %s1555_s27  ;;  %p1977_p1 = scmp.eq.s32.totalorder %s1657_s9, 0 }
   0x8   : > { %p227_p3 = scmp.eq.s32.totalorder %s1164_s10, 1  ;;  %p1165_p5 = scmp.ge.s32.totalorder %s1567_s30, 1 }
   0x9   : > { %p1666_p4 = por %p1977_p1, %p45_p0  ;;  %p234_p7 = scmp.lt.s32.totalorder %s1567_s30, 3 }
   0xa   : > { %p1671_p6 = por %p227_p3, %p45_p0  ;;  %s1569_s14 = smov [#allocation6]  }
   0xb   : > { %s1980_s11 = scalar_select %p1666_p4, 1, 0 }
   0xc   : > { %s1981_s12 = scalar_select %p1671_p6, 1, 0 }
   0xd   : > { %p1676_p8 = pnand %p1165_p5, %p234_p7  ;;  %s246_s15 = sshll.u32 %s1569_s14, 4  ;;  %s1680_s15 = int_to_ptr.vmem [resolvable:$true] %s246_s15 }
   0xe   : > { %s1570_s17 = smov [#allocation8]   ;;  %s1411_s21 = scalar_lea.hbm %s1970_s2, 256 }
   0xf   : > { %p1316_p9 = pneg %p1676_p8  ;;  %s262_s18 = sshll.u32 %s1570_s17, 4  ;;  %s1691_s18 = int_to_ptr.vmem [resolvable:$true] %s262_s18 }
  0x10   : > { %p1412_p12 = scmp.ne.s32.totalorder %s1970_s2, %s1411_s21  ;;  %p1418_p5 = scmp.lt.u32.totalorder %s1411_s21, %s1970_s2 }
  0x11   : > { %p1687_p11 = pnand %p1316_p9, %p1977_p1 }
  0x13   : > { %p1413_p13 = pneg %p1687_p11 }
  0x15   : > { %p1414_p0 = pnand %p1413_p13, %p1412_p12 }
  0x17   : > { %p1415_p3 = pneg %p1414_p0 }
  0x19   : > { %p1420_p7 = pnand %p1418_p5, %p1415_p3 }
  0x1b   : > { %1423 = shalt.err (!%p1420_p7)
}
  0x1c   : > { %s1424_s26 = scalar_lea.vmem %s1680_s15, 256  ;;  %p1432_p2 = scmp.lt.s32.totalorder %s1680_s15, %s1680_s15 }
  0x1d   : > { %p1425_p9 = scmp.ne.s32.totalorder %s1680_s15, %s1424_s26  ;;  %p1433_p12 = scmp.lt.s32.totalorder %s1424_s26, %s1424_s26 }
  0x1f   : > { %p1427_p10 = pnand %p1425_p9, %p1413_p13  ;;  %p1434_p0 = por %p1433_p12, %p1432_p2 }
  0x21   : > { %p1428_p1 = pneg %p1427_p10 }
  0x23   : > { %p1435_p6 = pnand %p1434_p0, %p1428_p1 }
  0x25   : > { %1438 = shalt.err (!%p1435_p6)
}
  0x26   : > { %s1571_s10 = smov 64   ;;  %s1572_s14 = smov 4  }
  0x27   : > { %1319 = dma.hbm_to_vmem [thread:$0]  (!%p1687_p11), %s1970_s2, 256, %s1680_s15, [#allocation7], %s1571_s10, %s1571_s10, %s1572_s14  }
  0x28   : > { %s1439_s22 = scalar_lea.hbm %s1972_s4, 256 }
  0x29   : > { %p1440_p2 = scmp.ne.s32.totalorder %s1972_s4, %s1439_s22  ;;  %p1446_p10 = scmp.lt.u32.totalorder %s1439_s22, %s1972_s4 }
  0x2b   : > { %p1442_p1 = pnand %p1440_p2, %p1413_p13 }
  0x2d   : > { %p1443_p6 = pneg %p1442_p1 }
  0x2f   : > { %p1448_p3 = pnand %p1446_p10, %p1443_p6 }
  0x31   : > { %1451 = shalt.err (!%p1448_p3)
}
  0x32   : > { %s1452_s15 = scalar_lea.vmem %s1691_s18, 256  ;;  %p1460_p12 = scmp.lt.s32.totalorder %s1691_s18, %s1691_s18 }
  0x33   : > { %p1453_p5 = scmp.ne.s32.totalorder %s1691_s18, %s1452_s15  ;;  %p1461_p0 = scmp.lt.s32.totalorder %s1452_s15, %s1452_s15 }
  0x35   : > { %p1455_p7 = pnand %p1453_p5, %p1413_p13  ;;  %p1462_p2 = por %p1461_p0, %p1460_p12 }
  0x37   : > { %p1456_p9 = pneg %p1455_p7 }
  0x39   : > { %p1463_p1 = pnand %p1462_p2, %p1456_p9 }
  0x3b   : > { %1466 = shalt.err (!%p1463_p1)
}
  0x3c   : > { %1322 = dma.hbm_to_vmem [thread:$0]  (!%p1687_p11), %s1972_s4, 256, %s1691_s18, [#allocation7], %s1571_s10, %s1571_s10, %s1572_s14  }
  0x3d   : > { %s1746_s20 = sadd.s32 1, %s1567_s30   ;;  %s32_s16 = sadd.s32 1, %s1563_s29 }
  0x3e   : > { %s29_s21 = ssub.s32 %s1567_s30, %s1746_s20  ;;  %p39_p13 = scmp.ne.s32.totalorder %s1563_s29, %s1559_s28 }
  0x3f   : > { %p30_p6 = scmp.eq.s32.totalorder %s29_s21, 0  ;;  %p40_p10 = scmp.eq.s32.totalorder %s1567_s30, 0 }
  0x40   : > { %p1984_p3 = scmp.eq.s32.totalorder %s1657_s9, 1  ;;  %p1333_p7 = scmp.lt.s32.totalorder %s1567_s30, 2 }
  0x41   : > { %s1762_s23 = scalar_select %p30_p6, %s1563_s29, %s32_s16  }
  0x42   : > { %p1756_p5 = por %p1984_p3, %p39_p13  ;;  %p41_p9 = por %p40_p10, %p39_p13 }
  0x43   : > { %s285_s24 = sand.u32 1, %s1563_s29   ;;  %s1170_s18 = sshll.u32 %s1567_s30, 7 }
  0x44   : > { %s1985_s22 = scalar_select %p1756_p5, 1, 0 }
  0x45   : > { %s1169_s25 = sshll.u32 %s285_s24, 3  ;;  %s1769_s26 = scalar_lea.hbm %s1968_s0, %s1170_s18 }
  0x46   : > { %s289_s15 = scalar_lea.vmem [#allocation3], %s1169_s25  ;;  %p1773_p11 = pnand %p1333_p7, %p41_p9 }
  0x47   : > { %s296_s17 = sshll.u32 %s289_s15, 4  ;;  %s286_s16 = scalar_lea.sflag [#allocation4], %s285_s24  ;;  %s1771_s17 = int_to_ptr.vmem [resolvable:$true] %s296_s17 }
  0x48   : > { %s1467_s21 = scalar_lea.hbm %s1769_s26, 128  ;;  %p1469_p0 = pneg %p1773_p11 }
  0x49   : > { %p1468_p12 = scmp.ne.s32.totalorder %s1769_s26, %s1467_s21  ;;  %s1472_s10 = scalar_lea.hbm %s1968_s0, 256 }
  0x4a   : > { %p1473_p13 = scmp.lt.u32.totalorder %s1769_s26, %s1968_s0  ;;  %p1474_p6 = scmp.lt.u32.totalorder %s1472_s10, %s1467_s21 }
  0x4b   : > { %p1470_p2 = pnand %p1469_p0, %p1468_p12  ;;  %p1476_p3 = scmp.lt.u32.totalorder %s1467_s21, %s1769_s26 }
  0x4c   : > { %p1475_p10 = por %p1474_p6, %p1473_p13 }
  0x4d   : > { %p1471_p1 = pneg %p1470_p2 }
  0x4e   : > { %p1477_p7 = por %p1476_p3, %p1475_p10 }
  0x50   : > { %p1478_p9 = pnand %p1477_p7, %p1471_p1 }
  0x52   : > { %1481 = shalt.err (!%p1478_p9)
}
  0x53   : > { %s1482_s24 = scalar_lea.vmem %s1771_s17, 128  ;;  %s1573_s18 = smov [#allocation3]  }
  0x54   : > { %p1483_p12 = scmp.ne.s32.totalorder %s1771_s17, %s1482_s24  ;;  %s1487_s25 = sshll.u32 %s1573_s18, 4  ;;  %s1488_s25 = int_to_ptr.vmem [resolvable:$false] %s1487_s25 }
  0x55   : > { %s1489_s14 = scalar_lea.vmem %s1488_s25, 256  ;;  %p1490_p4 = scmp.lt.s32.totalorder %s1771_s17, %s1488_s25 }
  0x56   : > { %p1485_p2 = pnand %p1483_p12, %p1469_p0  ;;  %p1491_p13 = scmp.lt.s32.totalorder %s1489_s14, %s1482_s24 }
  0x58   : > { %p1486_p5 = pneg %p1485_p2  ;;  %p1492_p6 = por %p1491_p13, %p1490_p4 }
  0x5a   : > { %p1493_p10 = pnand %p1492_p6, %p1486_p5 }
  0x5c   : > { %1496 = shalt.err (!%p1493_p10)
}
  0x5d   : > { %1326 = dma.hbm_to_vmem [thread:$0]  (!%p1773_p11), %s1769_s26, 128, %s1771_s17, %s286_s16  }
  0x5e   : > { %311 = sbr.rel (%p1676_p8) target bundleno = 1831 (0x727), region = 52  ;;  %s1805_s21 = sand.u32 (!%p1676_p8), 1, %s1559_s28  }
  0x5f   : > { %s1172_s10 = sshll.u32 (!%p1676_p8), %s1805_s21, 3  ;;  %s314_s15 = scalar_lea.sflag (!%p1676_p8), [#allocation4], %s1805_s21 }
  0x60   : > { %s317_s24 = scalar_lea.vmem (!%p1676_p8), [#allocation3], %s1172_s10  ;;  %p1987_p4 = scmp.ne.s32.totalorder (!%p1676_p8), %s1980_s11, 0 }
  0x65   : > { %1542 = dma.done.wait (%p1987_p4), %s314_s15, 128  }
  0x66   : > { %1544 = vsyncadd (%p1987_p4), %s314_s15, 4294967168  ;;  %p1988_p5 = scmp.eq.s32.totalorder %s1657_s9, 0 }
  0x68   : > { %1546 = dma.done.wait (%p1988_p5), [#allocation7], 512   ;;  %p1989_p11 = pmov %p1988_p5 }
  0x69   : > { %v1574_v0 = vmov 0.0   ;;  %vm1575_vm0 = vmmov 0   ;;  %v1389_v1 = vld [vmem:[#allocation6] sm:$0xff]   ;;  %v1390_v2 = vld [vmem:[#allocation6 + $0x8] sm:$0xff]   ;;  %v1823_v3 = vld [vmem:[%s317_s24] sm:$0xff]  ;;  %vm390_vm1 = vcmask 261120  }
  0x6a   : > { %1548 = vsyncadd (%p1989_p11), [#allocation7], 4294966784  ;;  %1232 = vmatprep.subr.bf16.mxu0 %v1574_v0  ;;  %1236 = vmatprep.mubr.msk.bf16.mxu0 %vm1575_vm0, %v1574_v0  ;;  %v366_v4 = vpack.c.bf16 %v1823_v3, %v1823_v3  ;;  %v1176_v5 = vld [vmem:[%s1971_s3] ss:$0 sm:$0xff]  ;;  %s1576_s26 = smov 120   ;;  %s1577_s17 = smov 96  }
  0x6b   : > { %1240 = vmatprep.subr.bf16.mxu1 %v1574_v0  ;;  %1242 = vmatprep.mubr.msk.bf16.mxu1 %vm1575_vm0, %v1574_v0  ;;  %s1578_s19 = smov 80   ;;  %s1579_s16 = smov 88   ;;  %vm445_vm2 = vcmask 64512   ;;  %vm509_vm3 = vcmask 1043456   ;;  %vm554_vm4 = vcmask 60416   ;;  %vm673_vm5 = vcmask 126016  }
  0x6c   : > { %1233 = vmatpush3.bf16.msra.mxu0 %v1389_v1  ;;  %s1580_s18 = smov 72   ;;  %s1581_s25 = smov 112   ;;  %vm792_vm6 = vcmask 191616   ;;  %vm911_vm7 = vcmask 257216   ;;  %vm1050_vm8 = vcmask 257024  }
  0x6d   : > { %1234 = vmatprep.subr.bf16.mxu0 %v1574_v0  ;;  %s1582_s14 = smov 104   ;;  %p361_p8 = scmp.lt.s32.totalorder %s1657_s9, 1 }
  0x6e   : > { %s1583_s13 = smov 56   ;;  %p1990_p1 = scmp.ne.s32.totalorder %s1985_s22, 0 }
  0x6f   : > { %s362_s10 = scalar_select %p361_p8, %s1657_s9, 1 }
  0x70   : > { %1235 = vmatpush3.bf16.msra.mxu0 %v1390_v2 }
  0x71   : > { %1246 = vmatprep.subr.bf16.mxu0 %v1574_v0  ;;  %s363_s11 = scalar_lea.vmem %s1969_s1, %s362_s10 }
  0x72   : > { %v1180_v23 = vld [vmem:[%s363_s11] ss:$0 sm:$0xff]  ;;  %s1590_s11 = smov [#allocation9]  }
  0x73   : > { %1237 = vmatmul.mubr.msk.bf16.vlgmr.msra.gmra.mrb[0].mxu0 %vm390_vm1, %v366_v4 }
  0x74   : > { %1248 = vmatprep.mubr.msk.bf16.mxu0 %vm1575_vm0, %v1574_v0 }
 0x146   : > { %v428_v6 = vpop.f32.mrb[0].mxu0 }
 0x147   : > { %v429_v7 = vadd.f32 %v1176_v5, %v428_v6  ;;  %v1238_v8 = vpop.f32.mrb[1].mxu0 }
 0x148   : > { %v431_v9 = vpop.f32.mrb[2].mxu0 }
 0x149   : > { %v1835_v10 = vpack.c.bf16 %v429_v7, %v429_v7  ;;  %v1239_v11 = vpop.f32.mrb[3].mxu0 }
 0x14b   : > { %556 = vrot.lane.b32.xlu1 %v1835_v10, %s1576_s26  ;;  %443 = vrot.lane.b32.xlu0 %v1835_v10, %s1577_s17  ;;  %s1584_s26 = smov 64   ;;  %s1585_s17 = smov 40  }
 0x14f   : > { %677 = vrot.lane.b32.xlu1 %v1835_v10, %s1578_s19  ;;  %558 = vrot.lane.b32.xlu0 %v1835_v10, %s1579_s16  ;;  %s1586_s19 = smov 48   ;;  %s1587_s16 = smov 8  }
 0x153   : > { %796 = vrot.lane.b32.xlu1 %v1835_v10, %s1580_s18  ;;  %675 = vrot.lane.b32.xlu0 %v1835_v10, %s1581_s25  ;;  %s1588_s18 = smov 16   ;;  %s1589_s25 = smov 24  }
 0x157   : > { %794 = vrot.lane.b32.xlu0 %v1835_v10, %s1582_s14 }
 0x1bd   : > { %v444_v12 = vpop.permute.xlu0 %443  ;;  %v557_v15 = vpop.permute.xlu1 %556 }
 0x1be   : > { %v450_v13 = vsel %vm445_vm2, %v444_v12, 0 }
 0x1bf   : > { %1241 = vmatpush3.bf16.xpose.msra.mxu1 %v450_v13 }
 0x1c0   : > { %1252 = vmatprep.subr.bf16.mxu1 %v1574_v0 }
 0x1c1   : > { %v559_v14 = vpop.permute.xlu0 %558  ;;  %v678_v17 = vpop.permute.xlu1 %677 }
 0x1c2   : > { %v564_v16 = vsel %vm445_vm2, %v559_v14, 0  ;;  %v683_v18 = vsel %vm445_vm2, %v678_v17, 0 }
 0x1c5   : > { %v797_v19 = vpop.permute.xlu1 %796  ;;  %v676_v20 = vpop.permute.xlu0 %675 }
 0x1c6   : > { %1243 = vmatmul.mubr.msk.bf16.vlgmr.msra.gmra.mrb[0].mxu1 %vm445_vm2, %v1835_v10  ;;  %v802_v21 = vsel %vm445_vm2, %v797_v19, 0 }
 0x1c7   : > { %1253 = vmatpush3.bf16.xpose.msra.mxu1 %v564_v16  ;;  %1254 = vmatprep.mubr.msk.bf16.mxu1 %vm1575_vm0, %v1574_v0 }
 0x1c8   : > { %1264 = vmatprep.subr.bf16.mxu1 %v1574_v0 }
 0x1c9   : > { %v795_v22 = vpop.permute.xlu0 %794 }
 0x1ce   : > { %1255 = vmatmul.mubr.msk.bf16.vlgmr.msra.gmra.mrb[4].mxu1 %vm445_vm2, %v557_v15 }
 0x1cf   : > { %1265 = vmatpush3.bf16.xpose.msra.mxu1 %v683_v18  ;;  %1266 = vmatprep.mubr.msk.bf16.mxu1 %vm1575_vm0, %v1574_v0 }
 0x1d0   : > { %1276 = vmatprep.subr.bf16.mxu1 %v1574_v0 }
 0x1d6   : > { %1267 = vmatmul.mubr.msk.bf16.vlgmr.msra.gmra.mrb[8].mxu1 %vm445_vm2, %v676_v20 }
 0x1d7   : > { %1277 = vmatpush3.bf16.xpose.msra.mxu1 %v802_v21  ;;  %1278 = vmatprep.mubr.msk.bf16.mxu1 %vm1575_vm0, %v1574_v0 }
 0x1d8   : > { %1288 = vmatprep.subr.bf16.mxu1 %v1574_v0 }
 0x1de   : > { %1279 = vmatmul.mubr.msk.bf16.vlgmr.msra.gmra.mrb[12].mxu1 %vm445_vm2, %v795_v22 }
 0x1df   : > { %1292 = vmatprep.mubr.msk.bf16.mxu1 %vm1575_vm0, %v1574_v0 }
 0x299   : > { %v486_v24 = vpop.f32.mrb[0].mxu1 }
 0x29a   : > { %v487_v25 = vadd.f32 %v1180_v23, %v486_v24  ;;  %v1244_v26 = vpop.f32.mrb[1].mxu1 }
 0x29b   : > { %v489_v27 = vpop.f32.mrb[2].mxu1 }
 0x29c   : > { %v1245_v28 = vpop.f32.mrb[3].mxu1  ;;  %v492_v29 = vsel %vm445_vm2, %v487_v25, -inf }
 0x29d   : > { %493 = vmax.xlane.f32.xlu1 %v492_v29 }
 0x2a1   : > { %v600_v30 = vpop.f32.mrb[4].mxu1 }
 0x2a2   : > { %v601_v31 = vadd.f32 %v1180_v23, %v600_v30  ;;  %v1256_v32 = vpop.f32.mrb[5].mxu1 }
 0x2a3   : > { %v603_v33 = vpop.f32.mrb[6].mxu1 }
 0x2a4   : > { %v1257_v34 = vpop.f32.mrb[7].mxu1  ;;  %v606_v35 = vsel %vm445_vm2, %v601_v31, -inf }
 0x2a5   : > { %607 = vmax.xlane.f32.xlu0 %v606_v35 }
 0x2a9   : > { %v719_v36 = vpop.f32.mrb[8].mxu1 }
 0x2aa   : > { %v720_v37 = vadd.f32 %v1180_v23, %v719_v36  ;;  %v1268_v38 = vpop.f32.mrb[9].mxu1 }
 0x2ab   : > { %v722_v39 = vpop.f32.mrb[10].mxu1 }
 0x2ac   : > { %v1269_v40 = vpop.f32.mrb[11].mxu1  ;;  %v725_v41 = vsel %vm445_vm2, %v720_v37, -inf }
 0x2ad   : > { %726 = vmax.xlane.f32.xlu0 %v725_v41  ;;  %v1391_v40 = vld [vmem:[#allocation8] sm:$0xff]   ;;  %v1392_v41 = vld [vmem:[#allocation8 + $0x8] sm:$0xff]  }
 0x2ae   : > { %1289 = vmatpush3.bf16.msra.mxu1 %v1391_v40 }
 0x2af   : > { %1290 = vmatprep.subr.bf16.mxu1 %v1574_v0 }
 0x2b1   : > { %v838_v42 = vpop.f32.mrb[12].mxu1 }
 0x2b2   : > { %v839_v43 = vadd.f32 %v1180_v23, %v838_v42  ;;  %v1280_v44 = vpop.f32.mrb[13].mxu1  ;;  %1291 = vmatpush3.bf16.msra.mxu1 %v1392_v41 }
 0x2b3   : > { %v841_v45 = vpop.f32.mrb[14].mxu1 }
 0x2b4   : > { %v1281_v46 = vpop.f32.mrb[15].mxu1  ;;  %v844_v47 = vsel %vm445_vm2, %v839_v43, -inf }
 0x2b5   : > { %845 = vmax.xlane.f32.xlu1 %v844_v47 }
 0x32a   : > { %v494_v48 = vpop.xlane.xlu1 %493 }
 0x32b   : > { %v495_v49 = vsub.f32 %v487_v25, %v494_v48 }
 0x32d   : > { %v496_v50 = vmul.f32 1.442695, %v495_v49 }
 0x32f   : > { %1395 = vpow2.f32 %v496_v50 }
 0x332   : > { %v608_v51 = vpop.xlane.xlu0 %607 }
 0x333   : > { %v609_v52 = vsub.f32 %v601_v31, %v608_v51 }
 0x335   : > { %v610_v53 = vmul.f32 1.442695, %v609_v52 }
 0x337   : > { %1397 = vpow2.f32 %v610_v53 }
 0x339   : > { %v1396_v54 = vpop.eup %1395 }
 0x33a   : > { %v727_v55 = vpop.xlane.xlu0 %726  ;;  %v498_v56 = vsel %vm445_vm2, %v1396_v54, 0.0 }
 0x33b   : > { %v728_v57 = vsub.f32 %v720_v37, %v727_v55  ;;  %499 = vadd.xlane.f32.xlu0 %v498_v56  ;;  %v1393_v56 = vld [vmem:[%s1974_s6] sm:$0xff]  }
 0x33d   : > { %v729_v58 = vmul.f32 1.442695, %v728_v57  ;;  %v1394_v57 = vld [vmem:[%s1974_s6 + $0x8] sm:$0xff]  }
 0x33f   : > { %1399 = vpow2.f32 %v729_v58 }
 0x341   : > { %v1398_v59 = vpop.eup %1397 }
 0x342   : > { %v612_v60 = vsel %vm445_vm2, %v1398_v59, 0.0  ;;  %v846_v63 = vpop.xlane.xlu1 %845 }
 0x343   : > { %613 = vadd.xlane.f32.xlu1 %v612_v60  ;;  %v847_v1 = vsub.f32 %v839_v43, %v846_v63 }
 0x345   : > { %v848_v2 = vmul.f32 1.442695, %v847_v1 }
 0x347   : > { %1401 = vpow2.f32 %v848_v2 }
 0x349   : > { %v1400_v61 = vpop.eup %1399 }
 0x34a   : > { %v731_v62 = vsel %vm445_vm2, %v1400_v61, 0.0 }
 0x34b   : > { %732 = vadd.xlane.f32.xlu0 %v731_v62 }
 0x351   : > { %v1402_v4 = vpop.eup %1401 }
 0x352   : > { %v850_v5 = vsel %vm445_vm2, %v1402_v4, 0.0 }
 0x354   : > { %618 = vrot.lane.b32.xlu1 %v1835_v10, %s1583_s13  ;;  %s1501_s13 = sshll.u32 %s1590_s11, 4  ;;  %s1502_s13 = int_to_ptr.vmem [resolvable:$false] %s1501_s13 }
 0x361   : > { %504 = vrot.lane.b32.xlu0 %v1835_v10, %s1584_s26  ;;  %s1175_s26 = sshll.u32 %s1805_s21, 2 }
 0x365   : > { %856 = vrot.lane.b32.xlu0 %v1835_v10, %s1585_s17 }
 0x378   : > { %851 = vadd.xlane.f32.xlu1 %v850_v5 }
 0x389   : > { %737 = vrot.lane.b32.xlu1 %v1835_v10, %s1586_s19 }
 0x3c8   : > { %v500_v6 = vpop.xlane.xlu0 %499 }
 0x3c9   : > { %1403 = vrcp.f32 %v500_v6 }
 0x3d0   : > { %v614_v7 = vpop.xlane.xlu1 %613 }
 0x3d1   : > { %1405 = vrcp.f32 %v614_v7 }
 0x3d3   : > { %v1404_v8 = vpop.eup %1403 }
 0x3d4   : > { %v502_v11 = vmul.f32 %v1404_v8, %v1396_v54  ;;  %v619_v14 = vpop.permute.xlu1 %618 }
 0x3d5   : > { %v624_v17 = vsel %vm509_vm3, %v619_v14, 0 }
 0x3d6   : > { %v503_v15 = vpack.c.bf16 %v502_v11, %v502_v11 }
 0x3d8   : > { %v733_v9 = vpop.xlane.xlu0 %732 }
 0x3d9   : > { %1407 = vrcp.f32 %v733_v9 }
 0x3db   : > { %v1406_v16 = vpop.eup %1405 }
 0x3dc   : > { %v505_v12 = vpop.permute.xlu0 %504  ;;  %v616_v10 = vmul.f32 %v1406_v16, %v1398_v59  ;;  %v1195_v59 = vld [vmem:[%s1973_s5] ss:$0 sm:$0xff] }
 0x3dd   : > { %v511_v13 = vsel %vm509_vm3, %v505_v12, 0 }
 0x3de   : > { %1247 = vmatpush3.bf16.msra.mxu0 %v511_v13  ;;  %v617_v18 = vpack.c.bf16 %v616_v10, %v616_v10 }
 0x3df   : > { %1258 = vmatprep.subr.bf16.mxu0 %v1574_v0 }
 0x3e0   : > { %v857_v24 = vpop.permute.xlu0 %856 }
 0x3e1   : > { %1249 = vmatmul.mubr.msk.bf16.vlgmr.msra.gmra.mrb[4].mxu0 %vm445_vm2, %v503_v15  ;;  %v862_v26 = vsel %vm509_vm3, %v857_v24, 0 }
 0x3e2   : > { %1259 = vmatpush3.bf16.msra.mxu0 %v624_v17  ;;  %1260 = vmatprep.mubr.msk.bf16.mxu0 %vm1575_vm0, %v1574_v0 }
 0x3e3   : > { %1270 = vmatprep.subr.bf16.mxu0 %v1574_v0  ;;  %v1408_v19 = vpop.eup %1407 }
 0x3e4   : > { %v735_v21 = vmul.f32 %v1408_v19, %v1400_v61 }
 0x3e6   : > { %v736_v25 = vpack.c.bf16 %v735_v21, %v735_v21 }
 0x3e9   : > { %1261 = vmatmul.mubr.msk.bf16.vlgmr.msra.gmra.mrb[8].mxu0 %vm445_vm2, %v617_v18 }
 0x3ea   : > { %1272 = vmatprep.mubr.msk.bf16.mxu0 %vm1575_vm0, %v1574_v0 }
 0x405   : > { %v852_v20 = vpop.xlane.xlu1 %851 }
 0x406   : > { %1409 = vrcp.f32 %v852_v20 }
 0x409   : > { %v738_v22 = vpop.permute.xlu1 %737 }
 0x40a   : > { %v743_v23 = vsel %vm509_vm3, %v738_v22, 0 }
 0x40b   : > { %1271 = vmatpush3.bf16.msra.mxu0 %v743_v23 }
 0x40c   : > { %1282 = vmatprep.subr.bf16.mxu0 %v1574_v0 }
 0x40e   : > { %1273 = vmatmul.mubr.msk.bf16.vlgmr.msra.gmra.mrb[12].mxu0 %vm445_vm2, %v736_v25 }
 0x40f   : > { %1283 = vmatpush3.bf16.msra.mxu0 %v862_v26  ;;  %1284 = vmatprep.mubr.msk.bf16.mxu0 %vm1575_vm0, %v1574_v0 }
 0x410   : > { %v1410_v27 = vpop.eup %1409  ;;  %1296 = vmatprep.subr.bf16.mxu0 %v1574_v0 }
 0x411   : > { %v854_v28 = vmul.f32 %v1410_v27, %v1402_v4 }
 0x413   : > { %v855_v29 = vpack.c.bf16 %v854_v28, %v854_v28 }
 0x416   : > { %1285 = vmatmul.mubr.msk.bf16.vlgmr.msra.gmra.mrb[16].mxu0 %vm445_vm2, %v855_v29 }
 0x417   : > { %1300 = vmatprep.mubr.msk.bf16.mxu0 %vm1575_vm0, %v1574_v0  ;;  %1297 = vmatpush3.bf16.msra.mxu0 %v1393_v56 }
 0x418   : > { %1298 = vmatprep.subr.bf16.mxu0 %v1574_v0  ;;  %v1196_v0 = vld [vmem:[%s1975_s7] ss:$0 sm:$0xff] }
 0x41b   : > { %1299 = vmatpush3.bf16.msra.mxu0 %v1394_v57 }
 0x4b4   : > { %v547_v30 = vpop.f32.mrb[4].mxu0 }
 0x4b5   : > { %v553_v31 = vpack.c.bf16 %v547_v30, %v547_v30  ;;  %v1250_v32 = vpop.f32.mrb[5].mxu0 }
 0x4b6   : > { %v550_v33 = vpop.f32.mrb[6].mxu0 }
 0x4b7   : > { %555 = vst.msk [vmem:[#allocation2] sm:$0xf] %vm554_vm4, %v553_v31  ;;  %v1251_v34 = vpop.f32.mrb[7].mxu0 }
 0x4bc   : > { %v660_v35 = vpop.f32.mrb[8].mxu0 }
 0x4bd   : > { %v1204_v36 = vpack.c.bf16 %v660_v35, %v660_v35  ;;  %v1262_v37 = vpop.f32.mrb[9].mxu0 }
 0x4be   : > { %v663_v38 = vpop.f32.mrb[10].mxu0 }
 0x4bf   : > { %670 = vrot.lane.b32.xlu1 %v1204_v36, %s1587_s16  ;;  %v1263_v39 = vpop.f32.mrb[11].mxu0  ;;  %s1201_s16 = sshll.u32 %s1657_s9, 6  ;;  %s1053_s9 = scalar_lea.sflag [#allocation5], %s1805_s21 }
 0x4c0   : > { %s1924_s15 = scalar_lea.hbm %s1976_s8, %s1201_s16 }
 0x4e1   : > { %v779_v42 = vpop.f32.mrb[12].mxu0 }
 0x4e2   : > { %v1205_v43 = vpack.c.bf16 %v779_v42, %v779_v42  ;;  %v1274_v44 = vpop.f32.mrb[13].mxu0 }
 0x4e3   : > { %v782_v45 = vpop.f32.mrb[14].mxu0 }
 0x4e4   : > { %789 = vrot.lane.b32.xlu0 %v1205_v43, %s1588_s18  ;;  %v1275_v46 = vpop.f32.mrb[15].mxu0  ;;  %s360_s18 = scalar_lea.vmem [#allocation9], %s1175_s26  ;;  %s1503_s26 = scalar_lea.vmem %s1502_s13, 128 }
 0x4e9   : > { %v898_v47 = vpop.f32.mrb[16].mxu0 }
 0x4ea   : > { %v1206_v48 = vpack.c.bf16 %v898_v47, %v898_v47  ;;  %v1286_v49 = vpop.f32.mrb[17].mxu0 }
 0x4eb   : > { %v901_v50 = vpop.f32.mrb[18].mxu0 }
 0x4ec   : > { %908 = vrot.lane.b32.xlu1 %v1206_v48, %s1589_s25  ;;  %v1287_v51 = vpop.f32.mrb[19].mxu0  ;;  %s1066_s25 = sshll.u32 %s360_s18, 4  ;;  %s1926_s25 = int_to_ptr.vmem [resolvable:$true] %s1066_s25 }
 0x4ed   : > { %s1497_s24 = scalar_lea.vmem %s1926_s25, 64  ;;  %p1504_p9 = scmp.lt.s32.totalorder %s1926_s25, %s1502_s13 }
 0x4ee   : > { %p1498_p0 = scmp.ne.s32.totalorder %s1926_s25, %s1497_s24  ;;  %p1505_p12 = scmp.lt.s32.totalorder %s1503_s26, %s1497_s24 }
 0x4f0   : > { %p1499_p3 = pnand %p1498_p0, %p1990_p1  ;;  %p1506_p2 = por %p1505_p12, %p1504_p9 }
 0x4f2   : > { %p1500_p7 = pneg %p1499_p3 }
 0x4f4   : > { %p1507_p13 = pnand %p1506_p2, %p1500_p7 }
 0x531   : > { %v671_v52 = vpop.permute.xlu1 %670 }
 0x532   : > { %674 = vst.msk [vmem:[#allocation2] sm:$0xf] %vm673_vm5, %v671_v52 }
 0x556   : > { %v790_v53 = vpop.permute.xlu0 %789 }
 0x557   : > { %793 = vst.msk [vmem:[#allocation2] sm:$0xf] %vm792_vm6, %v790_v53 }
 0x55e   : > { %v909_v54 = vpop.permute.xlu1 %908 }
 0x55f   : > { %912 = vst.msk [vmem:[#allocation2] sm:$0xf] %vm911_vm7, %v909_v54 }
 0x566   : > { %v913_v55 = vld [vmem:[#allocation2] sm:$0xf] }
 0x567   : > { %1293 = vmatmul.mubr.msk.bf16.vlgmr.msra.gmra.mrb[16].mxu1 %vm390_vm1, %v913_v55 }
 0x63a   : > { %v967_v58 = vpop.f32.mrb[16].mxu1 }
 0x63b   : > { %v973_v60 = vadd.f32 %v967_v58, %v1823_v3  ;;  %v1294_v61 = vpop.f32.mrb[17].mxu1 }
 0x63c   : > { %v970_v62 = vpop.f32.mrb[18].mxu1 }
 0x63d   : > { %v981_v63 = vadd.f32 %v1195_v59, %v973_v60  ;;  %v1295_v1 = vpop.f32.mrb[19].mxu1 }
 0x63f   : > { %v982_v2 = vpack.c.bf16 %v981_v63, %v981_v63 }
 0x641   : > { %1301 = vmatmul.mubr.msk.bf16.vlgmr.msra.gmra.mrb[20].mxu0 %vm390_vm1, %v982_v2 }
 0x714   : > { %v1043_v4 = vpop.f32.mrb[20].mxu0 }
 0x715   : > { %v1044_v5 = vadd.f32 %v1196_v0, %v1043_v4  ;;  %v1302_v3 = vpop.f32.mrb[21].mxu0 }
 0x716   : > { %v1046_v6 = vpop.f32.mrb[22].mxu0 }
 0x717   : > { %v1049_v7 = vpack.c.bf16 %v1044_v5, %v1044_v5  ;;  %v1303_v8 = vpop.f32.mrb[23].mxu0 }
 0x719   : > { %1051 = vst.msk [vmem:[%s360_s18] sm:$0xf] %vm1050_vm8, %v1049_v7 }
 0x71a   : > { %1510 = shalt.err (!%p1507_p13)
}
 0x71b   : > { %s1511_s21 = scalar_lea.hbm %s1924_s15, 64  ;;  %s1515_s16 = scalar_lea.hbm %s1976_s8, 128 }
 0x71c   : > { %p1512_p6 = scmp.ne.s32.totalorder %s1924_s15, %s1511_s21  ;;  %p1516_p5 = scmp.lt.u32.totalorder %s1924_s15, %s1976_s8 }
 0x71d   : > { %p1517_p11 = scmp.lt.u32.totalorder %s1515_s16, %s1511_s21  ;;  %p1519_p0 = scmp.lt.u32.totalorder %s1511_s21, %s1924_s15 }
 0x71e   : > { %p1513_p10 = pnand %p1512_p6, %p1990_p1 }
 0x71f   : > { %p1518_p8 = por %p1517_p11, %p1516_p5 }
 0x720   : > { %p1514_p4 = pneg %p1513_p10 }
 0x721   : > { %p1520_p3 = por %p1519_p0, %p1518_p8 }
 0x723   : > { %p1521_p7 = pnand %p1520_p3, %p1514_p4 }
 0x725   : > { %1524 = shalt.err (!%p1521_p7)
}
 0x726   : > { %1314 = dma.vmem_to_hbm [thread:$0]  (%p1990_p1), %s1926_s25, 64, %s1924_s15, %s1053_s9  }
 0x727 PF: > { %s1078_s10 = sand.u32 1, %s1555_s27   ;;  %p1991_p9 = scmp.ne.s32.totalorder %s1981_s12, 0 }
 0x728   : > { %p1992_p12 = scmp.ge.s32.totalorder %s1567_s30, 2  ;;  %s1079_s24 = scalar_lea.sflag [#allocation5], %s1078_s10 }
 0x72a   : > { %p1328_p2 = pnand %p1992_p12, %p1991_p9 }
 0x72c   : > { %1550 = dma.done.wait (!%p1328_p2), %s1079_s24, 64  }
 0x72d   : > { %1552 = vsyncadd (!%p1328_p2), %s1079_s24, 4294967232  ;;  %p22_p13 = scmp.ge.s32.totalorder %s1746_s20, 4   ;;  %s1993_s27 = smov %s1559_s28 }
 0x72e   : > { %s1994_s28 = smov %s1563_s29  ;;  %s1995_s29 = smov %s1762_s23 }
 0x72f   : > { %s1996_s30 = smov %s1746_s20  ;;  %24 = sbr.rel (!%p22_p13) target bundleno = 6 (0x6), region = 108 }
 0x736   :  { %1084 = vsyncpa [#allocation4], 1 }
 0x737   :  { %1086 = vsyncpa [#allocation4 + $0x1], 1 }
 0x738   :  { %1087 = vsyncpa [#allocation7], 1 }
 0x739   :  { %1088 = vsyncpa [#allocation5], 1 }
 0x73a   :  { %1090 = vsyncpa [#allocation5 + $0x1], 1 }

</bundles_post_ra>
